<compile_context>
chip_gen: v6e
topology: v6e:2x2x1
jax: 0.10.0
libtpu: 0.0.40
codegen_flags: <defaults>
</compile_context>

<pallas_src>
import functools

import jax
import jax.numpy as jnp
from jax.experimental import pallas as pl
from jax.experimental.pallas import tpu as pltpu


def _round_up(n, m):
    return ((n + m - 1) // m) * m


def _mlmg_kernel(x2d_ref, slab_ref, out_ref, *, seq_len, batch, ih_rows, hp, op,
                 off_hh, off_brnn, off_fc, off_bfc):
    """Single-invocation MLMG forward (no grid; everything resident in VMEM).

    x2d_ref  : (seq_len * batch, ih_rows)  time-major rows, batch padded to 8,
               input dim zero-padded to a sublane multiple.
    slab_ref : (slab_rows, slab_w)         packed parameter slab:
               rows [0, ih_rows)            W_ih^T  (zero-padded to hp lanes)
               rows [off_hh, off_hh+hp)     W_hh^T  (zero-padded to hp x hp)
               row   off_brnn               b_ih + b_hh (zero-padded)
               rows [off_fc, off_fc+hp)     W_fc^T  (zero-padded to hp x op)
               row   off_bfc                b_fc    (padded lanes = -1e30)
    out_ref  : (batch, op)                 lane-dense log-softmax output.
    """
    wih_t = slab_ref[0:ih_rows, 0:hp]                # (ih_rows, hp)
    whh_t = slab_ref[off_hh:off_hh + hp, 0:hp]       # (hp, hp)
    b_rnn = slab_ref[off_brnn:off_brnn + 1, 0:hp]    # (1, hp)

    # Hoisted input projection: one (T*B, ih_rows) @ (ih_rows, hp) matmul with
    # the folded RNNCell bias, instead of seq_len tiny matmuls in the loop.
    xw = (
        jnp.dot(x2d_ref[...], wih_t, preferred_element_type=jnp.float32)
        + b_rnn
    )  # (seq_len * batch, hp); padded hidden lanes are exactly 0.

    # Serial recurrence, statically unrolled (seq_len is a small compile-time
    # constant). whh_t is loop-invariant so the MXU RHS stays staged across the
    # unrolled vmatmuls; padded hidden lanes remain 0 because tanh(0) == 0.
    h = jnp.zeros((batch, hp), jnp.float32)
    for t in range(seq_len):
        h = jnp.tanh(
            xw[t * batch:(t + 1) * batch, :]
            + jnp.dot(h, whh_t, preferred_element_type=jnp.float32)
        )

    # fc + LogSoftmax(dim=1) over a full 128-lane tile (unmasked stores,
    # full-lane XLU max/sum). Padded fc-bias lanes = -1e30 -> exp() == 0 there.
    wfc_t = slab_ref[off_fc:off_fc + hp, 0:op]       # (hp, op)
    b_fc = slab_ref[off_bfc:off_bfc + 1, 0:op]       # (1, op)
    logits = jnp.dot(h, wfc_t, preferred_element_type=jnp.float32) + b_fc
    m = jnp.max(logits, axis=1, keepdims=True)
    shifted = logits - m
    lse = jnp.log(jnp.sum(jnp.exp(shifted), axis=1, keepdims=True))
    out_ref[...] = (shifted - lse).astype(out_ref.dtype)


@jax.jit
def mlmg_forward(x, w_ih, w_hh, b_ih, b_hh, w_fc, b_fc):
    """Matches MLMG.forward: x is time-major (seq_len, batch, input_size)."""
    seq_len, batch, input_size = x.shape
    hidden_size = w_ih.shape[0]
    output_size = w_fc.shape[0]

    batch_p = _round_up(batch, 8)        # sublane-aligned rows
    ih_rows = _round_up(input_size, 8)   # sublane-aligned W_ih^T block
    hp = _round_up(hidden_size, 128)     # lane-dense hidden
    op = _round_up(output_size, 128)     # lane-dense output / log-softmax
    slab_w = max(hp, op)

    f32 = jnp.float32

    # --- input: pad batch (sublanes) and input dim, flatten time into rows ---
    x2d = jnp.pad(
        x.astype(f32),
        ((0, 0), (0, batch_p - batch), (0, ih_rows - input_size)),
    ).reshape(seq_len * batch_p, ih_rows)

    # --- pack all parameters into ONE (rows, slab_w) f32 slab (2 input DMAs) ---
    blk_ih = jnp.zeros((ih_rows, slab_w), f32).at[:input_size, :hidden_size].set(
        w_ih.T.astype(f32))
    blk_hh = jnp.zeros((hp, slab_w), f32).at[:hidden_size, :hidden_size].set(
        w_hh.T.astype(f32))
    blk_brnn = jnp.zeros((8, slab_w), f32).at[0, :hidden_size].set(
        (b_ih + b_hh).astype(f32))
    blk_fc = jnp.zeros((hp, slab_w), f32).at[:hidden_size, :output_size].set(
        w_fc.T.astype(f32))
    # Padded fc-bias lanes are a large negative constant (NOT 0) so the padded
    # logits vanish from the log-softmax normalizer.
    blk_bfc = jnp.full((8, slab_w), -1e30, f32).at[0, :output_size].set(
        b_fc.astype(f32))
    slab = jnp.concatenate([blk_ih, blk_hh, blk_brnn, blk_fc, blk_bfc], axis=0)

    off_hh = ih_rows
    off_brnn = off_hh + hp
    off_fc = off_brnn + 8
    off_bfc = off_fc + hp

    vmem = pl.BlockSpec(memory_space=pltpu.MemorySpace.VMEM)
    out = pl.pallas_call(
        functools.partial(
            _mlmg_kernel,
            seq_len=seq_len, batch=batch_p, ih_rows=ih_rows, hp=hp, op=op,
            off_hh=off_hh, off_brnn=off_brnn, off_fc=off_fc, off_bfc=off_bfc),
        out_shape=jax.ShapeDtypeStruct((batch_p, op), jnp.float32),
        in_specs=[vmem, vmem],
        out_specs=vmem,
    )(x2d, slab)

    # Drop padded batch rows / output lanes (fused into the jitted program).
    return out[:batch, :output_size]


def mlmg_reference(x, w_ih, w_hh, b_ih, b_hh, w_fc, b_fc):
    """Pure-JAX reference mirroring the PyTorch forward."""
    seq_len, batch, _ = x.shape
    hidden = w_ih.shape[0]
    h = jnp.zeros((batch, hidden), jnp.float32)
    for i in range(seq_len):
        h = jnp.tanh(x[i] @ w_ih.T + b_ih + h @ w_hh.T + b_hh)
    out = h @ w_fc.T + b_fc
    return jax.nn.log_softmax(out, axis=1)


if __name__ == "__main__":
    seq_len = 8
    batch = 4
    input_size = 16
    hidden_size = 32
    output_size = 10

    key = jax.random.PRNGKey(0)
    k_x, k_wih, k_whh, k_bih, k_bhh, k_wfc, k_bfc = jax.random.split(key, 7)

    # Deterministic init mimicking PyTorch's default RNNCell / Linear init.
    bound = 1.0 / (hidden_size ** 0.5)
    w_ih = jax.random.uniform(k_wih, (hidden_size, input_size), jnp.float32, -bound, bound)
    w_hh = jax.random.uniform(k_whh, (hidden_size, hidden_size), jnp.float32, -bound, bound)
    b_ih = jax.random.uniform(k_bih, (hidden_size,), jnp.float32, -bound, bound)
    b_hh = jax.random.uniform(k_bhh, (hidden_size,), jnp.float32, -bound, bound)
    w_fc = jax.random.uniform(k_wfc, (output_size, hidden_size), jnp.float32, -bound, bound)
    b_fc = jax.random.uniform(k_bfc, (output_size,), jnp.float32, -bound, bound)

    x = jax.random.normal(k_x, (seq_len, batch, input_size), jnp.float32)

    out = mlmg_forward(x, w_ih, w_hh, b_ih, b_hh, w_fc, b_fc)
    out = jax.block_until_ready(out)

    ref = mlmg_reference(x, w_ih, w_hh, b_ih, b_hh, w_fc, b_fc)
    assert out.shape == (batch, output_size)
    assert jnp.allclose(out, ref, atol=1e-4, rtol=1e-4), "mismatch vs reference"

    print("KERNEL_OK")
</pallas_src>

<mosaic_0001>
module attributes {stable_mosaic.version = 11 : i64} {
  func.func @_mlmg_kernel(%arg0: memref<64x16xf32, #tpu.memory_space<vmem>>, %arg1: memref<288x128xf32, #tpu.memory_space<vmem>>, %arg2: memref<8x128xf32, #tpu.memory_space<vmem>>) attributes {dimension_semantics = [], scalar_prefetch = 0 : i64, scratch_operands = 0 : i64, tpu.core_type = #tpu.core_type<tc>} {
    %c0 = arith.constant 0 : index
    %c0_0 = arith.constant 0 : index
    %0 = vector.load %arg1[%c0, %c0_0] : memref<288x128xf32, #tpu.memory_space<vmem>>, vector<16x128xf32>
    %c16 = arith.constant 16 : index
    %c0_1 = arith.constant 0 : index
    %1 = vector.load %arg1[%c16, %c0_1] : memref<288x128xf32, #tpu.memory_space<vmem>>, vector<128x128xf32>
    %c144 = arith.constant 144 : index
    %c0_2 = arith.constant 0 : index
    %2 = vector.load %arg1[%c144, %c0_2] : memref<288x128xf32, #tpu.memory_space<vmem>>, vector<1x128xf32>
    %c0_3 = arith.constant 0 : index
    %c0_4 = arith.constant 0 : index
    %3 = vector.load %arg0[%c0_3, %c0_4] : memref<64x16xf32, #tpu.memory_space<vmem>>, vector<64x16xf32>
    %cst = arith.constant dense<0.000000e+00> : vector<64x128xf32>
    %4 = tpu.matmul %3, %0, %cst {dimension_numbers = #tpu.dot_dimension_numbers<[1], [0], [0], [1], [0, 0, 1, 1], [], []>} : vector<64x16xf32>, vector<16x128xf32>, vector<64x128xf32> -> vector<64x128xf32>
    %5 = vector.broadcast %2 : vector<1x128xf32> to vector<64x128xf32>
    %6 = arith.addf %4, %5 : vector<64x128xf32>
    %cst_5 = arith.constant 0.000000e+00 : f32
    %7 = vector.broadcast %cst_5 : f32 to vector<8x128xf32>
    %8 = vector.extract_strided_slice %6 {offsets = [0, 0], sizes = [8, 128], strides = [1, 1]} : vector<64x128xf32> to vector<8x128xf32>
    %cst_6 = arith.constant dense<0.000000e+00> : vector<8x128xf32>
    %9 = tpu.matmul %7, %1, %cst_6 {dimension_numbers = #tpu.dot_dimension_numbers<[1], [0], [0], [1], [0, 0, 1, 1], [], []>} : vector<8x128xf32>, vector<128x128xf32>, vector<8x128xf32> -> vector<8x128xf32>
    %10 = arith.addf %8, %9 : vector<8x128xf32>
    %11 = math.tanh %10 : vector<8x128xf32>
    %12 = vector.extract_strided_slice %6 {offsets = [8, 0], sizes = [8, 128], strides = [1, 1]} : vector<64x128xf32> to vector<8x128xf32>
    %cst_7 = arith.constant dense<0.000000e+00> : vector<8x128xf32>
    %13 = tpu.matmul %11, %1, %cst_7 {dimension_numbers = #tpu.dot_dimension_numbers<[1], [0], [0], [1], [0, 0, 1, 1], [], []>} : vector<8x128xf32>, vector<128x128xf32>, vector<8x128xf32> -> vector<8x128xf32>
    %14 = arith.addf %12, %13 : vector<8x128xf32>
    %15 = math.tanh %14 : vector<8x128xf32>
    %16 = vector.extract_strided_slice %6 {offsets = [16, 0], sizes = [8, 128], strides = [1, 1]} : vector<64x128xf32> to vector<8x128xf32>
    %cst_8 = arith.constant dense<0.000000e+00> : vector<8x128xf32>
    %17 = tpu.matmul %15, %1, %cst_8 {dimension_numbers = #tpu.dot_dimension_numbers<[1], [0], [0], [1], [0, 0, 1, 1], [], []>} : vector<8x128xf32>, vector<128x128xf32>, vector<8x128xf32> -> vector<8x128xf32>
    %18 = arith.addf %16, %17 : vector<8x128xf32>
    %19 = math.tanh %18 : vector<8x128xf32>
    %20 = vector.extract_strided_slice %6 {offsets = [24, 0], sizes = [8, 128], strides = [1, 1]} : vector<64x128xf32> to vector<8x128xf32>
    %cst_9 = arith.constant dense<0.000000e+00> : vector<8x128xf32>
    %21 = tpu.matmul %19, %1, %cst_9 {dimension_numbers = #tpu.dot_dimension_numbers<[1], [0], [0], [1], [0, 0, 1, 1], [], []>} : vector<8x128xf32>, vector<128x128xf32>, vector<8x128xf32> -> vector<8x128xf32>
    %22 = arith.addf %20, %21 : vector<8x128xf32>
    %23 = math.tanh %22 : vector<8x128xf32>
    %24 = vector.extract_strided_slice %6 {offsets = [32, 0], sizes = [8, 128], strides = [1, 1]} : vector<64x128xf32> to vector<8x128xf32>
    %cst_10 = arith.constant dense<0.000000e+00> : vector<8x128xf32>
    %25 = tpu.matmul %23, %1, %cst_10 {dimension_numbers = #tpu.dot_dimension_numbers<[1], [0], [0], [1], [0, 0, 1, 1], [], []>} : vector<8x128xf32>, vector<128x128xf32>, vector<8x128xf32> -> vector<8x128xf32>
    %26 = arith.addf %24, %25 : vector<8x128xf32>
    %27 = math.tanh %26 : vector<8x128xf32>
    %28 = vector.extract_strided_slice %6 {offsets = [40, 0], sizes = [8, 128], strides = [1, 1]} : vector<64x128xf32> to vector<8x128xf32>
    %cst_11 = arith.constant dense<0.000000e+00> : vector<8x128xf32>
    %29 = tpu.matmul %27, %1, %cst_11 {dimension_numbers = #tpu.dot_dimension_numbers<[1], [0], [0], [1], [0, 0, 1, 1], [], []>} : vector<8x128xf32>, vector<128x128xf32>, vector<8x128xf32> -> vector<8x128xf32>
    %30 = arith.addf %28, %29 : vector<8x128xf32>
    %31 = math.tanh %30 : vector<8x128xf32>
    %32 = vector.extract_strided_slice %6 {offsets = [48, 0], sizes = [8, 128], strides = [1, 1]} : vector<64x128xf32> to vector<8x128xf32>
    %cst_12 = arith.constant dense<0.000000e+00> : vector<8x128xf32>
    %33 = tpu.matmul %31, %1, %cst_12 {dimension_numbers = #tpu.dot_dimension_numbers<[1], [0], [0], [1], [0, 0, 1, 1], [], []>} : vector<8x128xf32>, vector<128x128xf32>, vector<8x128xf32> -> vector<8x128xf32>
    %34 = arith.addf %32, %33 : vector<8x128xf32>
    %35 = math.tanh %34 : vector<8x128xf32>
    %36 = vector.extract_strided_slice %6 {offsets = [56, 0], sizes = [8, 128], strides = [1, 1]} : vector<64x128xf32> to vector<8x128xf32>
    %cst_13 = arith.constant dense<0.000000e+00> : vector<8x128xf32>
    %37 = tpu.matmul %35, %1, %cst_13 {dimension_numbers = #tpu.dot_dimension_numbers<[1], [0], [0], [1], [0, 0, 1, 1], [], []>} : vector<8x128xf32>, vector<128x128xf32>, vector<8x128xf32> -> vector<8x128xf32>
    %38 = arith.addf %36, %37 : vector<8x128xf32>
    %39 = math.tanh %38 : vector<8x128xf32>
    %c152 = arith.constant 152 : index
    %c0_14 = arith.constant 0 : index
    %40 = vector.load %arg1[%c152, %c0_14] : memref<288x128xf32, #tpu.memory_space<vmem>>, vector<128x128xf32>
    %c280 = arith.constant 280 : index
    %c0_15 = arith.constant 0 : index
    %41 = vector.load %arg1[%c280, %c0_15] : memref<288x128xf32, #tpu.memory_space<vmem>>, vector<1x128xf32>
    %cst_16 = arith.constant dense<0.000000e+00> : vector<8x128xf32>
    %42 = tpu.matmul %39, %40, %cst_16 {dimension_numbers = #tpu.dot_dimension_numbers<[1], [0], [0], [1], [0, 0, 1, 1], [], []>} : vector<8x128xf32>, vector<128x128xf32>, vector<8x128xf32> -> vector<8x128xf32>
    %43 = vector.broadcast %41 : vector<1x128xf32> to vector<8x128xf32>
    %44 = arith.addf %42, %43 : vector<8x128xf32>
    %cst_17 = arith.constant dense<0xFF800000> : vector<8xf32>
    %45 = vector.multi_reduction <maximumf>, %44, %cst_17 [1] : vector<8x128xf32> to vector<8xf32>
    %46 = vector.shape_cast %45 : vector<8xf32> to vector<8x1xf32>
    %47 = vector.broadcast %46 : vector<8x1xf32> to vector<8x128xf32>
    %48 = arith.subf %44, %47 : vector<8x128xf32>
    %49 = math.exp %48 : vector<8x128xf32>
    %cst_18 = arith.constant dense<0.000000e+00> : vector<8xf32>
    %50 = vector.multi_reduction <add>, %49, %cst_18 [1] : vector<8x128xf32> to vector<8xf32>
    %51 = vector.shape_cast %50 : vector<8xf32> to vector<8x1xf32>
    %52 = math.log %51 : vector<8x1xf32>
    %53 = vector.broadcast %52 : vector<8x1xf32> to vector<8x128xf32>
    %54 = arith.subf %48, %53 : vector<8x128xf32>
    %c0_19 = arith.constant 0 : index
    %c0_20 = arith.constant 0 : index
    %55 = vector.load %arg2[%c0_19, %c0_20] : memref<8x128xf32, #tpu.memory_space<vmem>>, vector<8x128xf32>
    tpu.vector_store %arg2[%c0_19, %c0_20], %54 {strides = array<i32>} : memref<8x128xf32, #tpu.memory_space<vmem>>, vector<8x128xf32>,
    return
  }
}

</mosaic_0001>

<bundles_post_ra>
// kernel: mlmg_forward.1
= control target key start
LH: loop header
LB: loop body
LE: loop exit
PB: predicated region body
PF: predicated region fallthrough
CT: control target
= control target key end

     0   :  { %v1380_v0 = vmov 0.0   ;;  %vm1381_vm0 = vmmov 0   ;;  %vm42_vm1 = vcmask 130048   ;;  %s1888_s1 = inlined_call_operand.vmem [shape: f32[288,128], index: 1, kind: input, shape index: {}]   ;;  %s1889_s0 = inlined_call_operand.vmem [shape: f32[64,16], index: 0, kind: input, shape index: {}]   ;;  %s1890_s2 = inlined_call_operand.vmem [shape: f32[8,128], index: 2, kind: output, shape index: {}]  }
   0x1   :  { %1043 = vmatprep.subr.mxu1 %v1380_v0  ;;  %v1401_v1 = vld [vmem:[%s1888_s1 + $0x88] sm:$0xff]  ;;  %v1406_v2 = vld [vmem:[%s1888_s1 + $0x80] sm:$0xff]  ;;  %1075 = vmatprep.mubr.msk.f32.mxu1 %vm1381_vm0, %v1380_v0  ;;  %v1415_v3 = vld [vmem:[%s1888_s1 + $0x78] sm:$0xff] }
   0x2   :  { %1044 = vmatpush3.msra.mxu1 %v1401_v1  ;;  %v12_v4 = vld [vmem:[%s1888_s1 + $0x8] sm:$0xff]  ;;  %v1425_v5 = vld [vmem:[%s1888_s1 + $0x70] sm:$0xff]  ;;  %v11_v6 = vld [vmem:[%s1888_s1] sm:$0xff] }
   0x3   :  { %1045 = vmatprep.subr.mxu1 %v1380_v0  ;;  %1027 = vmatprep.subr.mxu0 %v12_v4  ;;  %v30_v7 = vld [vmem:[%s1889_s0] sm:$0xff]  ;;  %v1438_v8 = vld [vmem:[%s1888_s1 + $0x68] sm:$0xff]  ;;  %v1457_v11 = vld [vmem:[%s1888_s1 + $0x58] sm:$0xff] }
   0x4   :  { %1046 = vmatpush3.msra.mxu1 %v1406_v2  ;;  %1028 = vmatpush3.msra.mxu0 %v12_v4  ;;  %v31_v9 = vld [vmem:[%s1889_s0 + $0x8] sm:$0xff]  ;;  %v1448_v10 = vld [vmem:[%s1888_s1 + $0x60] sm:$0xff]  ;;  %v1466_v12 = vld [vmem:[%s1888_s1 + $0x50] sm:$0xff] }
   0x5   :  { %1047 = vmatprep.subr.mxu1 %v1380_v0  ;;  %1029 = vmatprep.subr.mxu0 %v11_v6  ;;  %v1475_v13 = vld [vmem:[%s1888_s1 + $0x48] sm:$0xff]  ;;  %v1484_v14 = vld [vmem:[%s1888_s1 + $0x40] sm:$0xff]  ;;  %v1493_v15 = vld [vmem:[%s1888_s1 + $0x38] sm:$0xff] }
   0x6   :  { %1048 = vmatpush3.msra.mxu1 %v1415_v3  ;;  %1030 = vmatpush3.msra.mxu0 %v11_v6  ;;  %v1502_v16 = vld [vmem:[%s1888_s1 + $0x30] sm:$0xff]  ;;  %v1511_v17 = vld [vmem:[%s1888_s1 + $0x28] sm:$0xff]  ;;  %v1520_v18 = vld [vmem:[%s1888_s1 + $0x20] sm:$0xff] }
   0x7   :  { %1049 = vmatprep.subr.mxu1 %v1380_v0  ;;  %1031 = vmatprep.mubr.msk.f32.mxu0 %vm42_vm1, %v30_v7  ;;  %v1529_v19 = vld [vmem:[%s1888_s1 + $0x18] sm:$0xff]  ;;  %v1538_v20 = vld [vmem:[%s1888_s1 + $0x10] sm:$0xff]  ;;  %v34_v23 = vld [vmem:[%s1889_s0 + $0x20] sm:$0xff] }
   0x8   :  { %1050 = vmatpush3.msra.mxu1 %v1425_v5  ;;  %1032 = vmatmul.mubr.msk.f32.vlgmr.msra.gmra.mxu0 %vm42_vm1, %v31_v9  ;;  %v32_v21 = vld [vmem:[%s1889_s0 + $0x10] sm:$0xff]  ;;  %v33_v22 = vld [vmem:[%s1889_s0 + $0x18] sm:$0xff]  ;;  %v35_v24 = vld [vmem:[%s1889_s0 + $0x28] sm:$0xff] }
   0x9   :  { %1051 = vmatprep.subr.mxu1 %v1380_v0  ;;  %1078 = vmatprep.subr.mxu0 %v1380_v0  ;;  %v36_v25 = vld [vmem:[%s1889_s0 + $0x30] sm:$0xff]  ;;  %v37_v26 = vld [vmem:[%s1889_s0 + $0x38] sm:$0xff]  ;;  %v762_v4 = vld [vmem:[%s1888_s1 + $0x108] sm:$0xff] }
   0xa   :  { %1052 = vmatpush3.msra.mxu1 %v1438_v8  ;;  %1079 = vmatpush3.msra.mxu0 %v1401_v1  ;;  %v1623_v28 = vld [vmem:[%s1888_s1 + $0x90] ss:$0 sm:$0xff]  ;;  %v760_v6 = vld [vmem:[%s1888_s1 + $0xf8] sm:$0xff]  ;;  %v757_v9 = vld [vmem:[%s1888_s1 + $0xe0] sm:$0xff] }
   0xb   :  { %1053 = vmatprep.subr.mxu1 %v1380_v0  ;;  %1080 = vmatprep.subr.mxu0 %v1380_v0  ;;  %v759_v7 = vld [vmem:[%s1888_s1 + $0xf0] sm:$0xff] }
   0xc   :  { %1054 = vmatpush3.msra.mxu1 %v1448_v10  ;;  %1081 = vmatpush3.msra.mxu0 %v1406_v2 }
   0xd   :  { %1055 = vmatprep.subr.mxu1 %v1380_v0  ;;  %1082 = vmatprep.subr.mxu0 %v1380_v0 }
   0xe   :  { %1056 = vmatpush3.msra.mxu1 %v1457_v11  ;;  %1083 = vmatpush3.msra.mxu0 %v1415_v3 }
   0xf   :  { %1057 = vmatprep.subr.mxu1 %v1380_v0  ;;  %1084 = vmatprep.subr.mxu0 %v1380_v0 }
  0x10   :  { %1058 = vmatpush3.msra.mxu1 %v1466_v12  ;;  %1085 = vmatpush3.msra.mxu0 %v1425_v5 }
  0x11   :  { %1059 = vmatprep.subr.mxu1 %v1380_v0  ;;  %1086 = vmatprep.subr.mxu0 %v1380_v0 }
  0x12   :  { %1060 = vmatpush3.msra.mxu1 %v1475_v13  ;;  %1087 = vmatpush3.msra.mxu0 %v1438_v8 }
  0x13   :  { %1061 = vmatprep.subr.mxu1 %v1380_v0  ;;  %1088 = vmatprep.subr.mxu0 %v1380_v0 }
  0x14   :  { %1062 = vmatpush3.msra.mxu1 %v1484_v14  ;;  %1089 = vmatpush3.msra.mxu0 %v1448_v10 }
  0x15   :  { %1063 = vmatprep.subr.mxu1 %v1380_v0  ;;  %1090 = vmatprep.subr.mxu0 %v1380_v0 }
  0x16   :  { %1064 = vmatpush3.msra.mxu1 %v1493_v15  ;;  %1091 = vmatpush3.msra.mxu0 %v1457_v11 }
  0x17   :  { %1065 = vmatprep.subr.mxu1 %v1380_v0  ;;  %1092 = vmatprep.subr.mxu0 %v1380_v0 }
  0x18   :  { %1066 = vmatpush3.msra.mxu1 %v1502_v16  ;;  %1093 = vmatpush3.msra.mxu0 %v1466_v12 }
  0x19   :  { %1067 = vmatprep.subr.mxu1 %v1380_v0  ;;  %1094 = vmatprep.subr.mxu0 %v1380_v0 }
  0x1a   :  { %1068 = vmatpush3.msra.mxu1 %v1511_v17  ;;  %1095 = vmatpush3.msra.mxu0 %v1475_v13 }
  0x1b   :  { %1069 = vmatprep.subr.mxu1 %v1380_v0  ;;  %1096 = vmatprep.subr.mxu0 %v1380_v0 }
  0x1c   :  { %1070 = vmatpush3.msra.mxu1 %v1520_v18  ;;  %1097 = vmatpush3.msra.mxu0 %v1484_v14 }
  0x1d   :  { %1071 = vmatprep.subr.mxu1 %v1380_v0  ;;  %1098 = vmatprep.subr.mxu0 %v1380_v0 }
  0x1e   :  { %1072 = vmatpush3.msra.mxu1 %v1529_v19  ;;  %1099 = vmatpush3.msra.mxu0 %v1493_v15 }
  0x1f   :  { %1073 = vmatprep.subr.mxu1 %v1380_v0  ;;  %1100 = vmatprep.subr.mxu0 %v1380_v0 }
  0x20   :  { %1074 = vmatpush3.msra.mxu1 %v1538_v20  ;;  %1101 = vmatpush3.msra.mxu0 %v1502_v16 }
  0x21   :  { %1076 = vmatmul.mubr.f32.vlgmr.msra.gmra.mxu1 %v1380_v0  ;;  %1113 = vmatprep.subr.mxu1 %v1380_v0 }
  0x22   :  { %1102 = vmatprep.subr.mxu0 %v1380_v0  ;;  %1114 = vmatpush3.msra.mxu1 %v1401_v1 }
  0x23   :  { %1103 = vmatpush3.msra.mxu0 %v1511_v17  ;;  %1115 = vmatprep.subr.mxu1 %v1380_v0 }
  0x24   :  { %1104 = vmatprep.subr.mxu0 %v1380_v0  ;;  %1116 = vmatpush3.msra.mxu1 %v1406_v2 }
  0x25   :  { %1105 = vmatpush3.msra.mxu0 %v1520_v18  ;;  %1117 = vmatprep.subr.mxu1 %v1380_v0 }
  0x26   :  { %1106 = vmatprep.subr.mxu0 %v1380_v0  ;;  %1118 = vmatpush3.msra.mxu1 %v1415_v3 }
  0x27   :  { %1107 = vmatpush3.msra.mxu0 %v1529_v19  ;;  %1119 = vmatprep.subr.mxu1 %v1380_v0 }
  0x28   :  { %1108 = vmatprep.subr.mxu0 %v1380_v0  ;;  %1120 = vmatpush3.msra.mxu1 %v1425_v5 }
  0x29   :  { %1109 = vmatpush3.msra.mxu0 %v1538_v20  ;;  %1121 = vmatprep.subr.mxu1 %v1380_v0 }
  0x2a   :  { %1122 = vmatpush3.msra.mxu1 %v1438_v8  ;;  %1145 = vmatprep.mubr.msk.f32.mxu1 %vm1381_vm0, %v1380_v0 }
  0x2b   :  { %1123 = vmatprep.subr.mxu1 %v1380_v0  ;;  %1148 = vmatprep.subr.mxu0 %v1380_v0 }
  0x2c   :  { %1124 = vmatpush3.msra.mxu1 %v1448_v10  ;;  %1034 = vmatprep.mubr.msk.f32.mxu0 %vm42_vm1, %v32_v21  ;;  %v750_v21 = vld [vmem:[%s1888_s1 + $0xa8] sm:$0xff] }
  0x2d   :  { %1125 = vmatprep.subr.mxu1 %v1380_v0  ;;  %1035 = vmatmul.mubr.msk.f32.gmra.mxu0 %vm42_vm1, %v33_v22  ;;  %v749_v22 = vld [vmem:[%s1888_s1 + $0xa0] sm:$0xff] }
  0x2e   :  { %1126 = vmatpush3.msra.mxu1 %v1457_v11  ;;  %1037 = vmatprep.mubr.msk.f32.mxu0 %vm42_vm1, %v34_v23  ;;  %v748_v23 = vld [vmem:[%s1888_s1 + $0x98] sm:$0xff] }
  0x2f   :  { %1127 = vmatprep.subr.mxu1 %v1380_v0 }
  0x30   :  { %1128 = vmatpush3.msra.mxu1 %v1466_v12 }
  0x31   :  { %1129 = vmatprep.subr.mxu1 %v1380_v0  ;;  %1038 = vmatmul.mubr.msk.f32.gmra.mxu0 %vm42_vm1, %v35_v24 }
  0x32   :  { %1130 = vmatpush3.msra.mxu1 %v1475_v13  ;;  %1040 = vmatprep.mubr.msk.f32.mxu0 %vm42_vm1, %v36_v25 }
  0x33   :  { %1131 = vmatprep.subr.mxu1 %v1380_v0 }
  0x34   :  { %1132 = vmatpush3.msra.mxu1 %v1484_v14 }
  0x35   :  { %1133 = vmatprep.subr.mxu1 %v1380_v0  ;;  %1041 = vmatmul.mubr.msk.f32.gmra.mxu0 %vm42_vm1, %v37_v26 }
  0x36   :  { %1134 = vmatpush3.msra.mxu1 %v1493_v15  ;;  %1110 = vmatprep.mubr.msk.f32.mxu0 %vm1381_vm0, %v1380_v0 }
  0x37   :  { %1135 = vmatprep.subr.mxu1 %v1380_v0 }
  0x38   :  { %1136 = vmatpush3.msra.mxu1 %v1502_v16 }
  0x39   :  { %1137 = vmatprep.subr.mxu1 %v1380_v0 }
  0x3a   :  { %1138 = vmatpush3.msra.mxu1 %v1511_v17 }
  0x3b   :  { %1139 = vmatprep.subr.mxu1 %v1380_v0 }
  0x3c   :  { %1140 = vmatpush3.msra.mxu1 %v1520_v18 }
  0x3d   :  { %1141 = vmatprep.subr.mxu1 %v1380_v0 }
  0x3e   :  { %1142 = vmatpush3.msra.mxu1 %v1529_v19 }
  0x3f   :  { %1143 = vmatprep.subr.mxu1 %v1380_v0 }
  0x40   :  { %1144 = vmatpush3.msra.mxu1 %v1538_v20 }
  0x41   :  { %1183 = vmatprep.subr.mxu1 %v1380_v0 }
  0xc8   :  { %v1033_v27 = vpop.f32.mrf.mxu0 }
  0xc9   :  { %v139_v41 = vadd.f32 %v1033_v27, %v1623_v28 }
  0xca   :  { %v133_v29 = vpop.f32.mrf.mxu0 }
  0xcb   :  { %v134_v30 = vadd.f32 %v1623_v28, %v133_v29 }
  0xe1   :  { %v238_v31 = vpop.f32.mrf.mxu1 }
  0xe2   :  { %v242_v32 = vadd.f32 %v238_v31, %v134_v30  ;;  %v863_v30 = vld [vmem:[%s1888_s1 + $0x118] ss:$0 sm:$0xff] }
  0xe3   :  { %v1077_v33 = vpop.f32.mrf.mxu1 }
  0xe4   :  { %1360 = vtanh.f32 %v242_v32 }
  0xed   :  { %v1660_v35 = vpop.f32.mrf.mxu0 }
  0xee   :  { %v149_v51 = vadd.f32 %v1660_v35, %v1623_v28 }
  0xef   :  { %v143_v36 = vpop.f32.mrf.mxu0 }
  0xf0   :  { %v144_v46 = vadd.f32 %v1623_v28, %v143_v36 }
  0xf1   :  { %v1361_v34 = vpop.eup %1360  ;;  %v1662_v37 = vpop.f32.mrf.mxu0 }
  0xf2   :  { %1111 = vmatmul.mubr.f32.vlgmr.msra.gmra.mxu0 %v1361_v34  ;;  %v159_v61 = vadd.f32 %v1662_v37, %v1623_v28 }
  0xf3   :  { %1149 = vmatpush3.msra.mxu0 %v1401_v1  ;;  %1180 = vmatprep.mubr.msk.f32.mxu0 %vm1381_vm0, %v1380_v0  ;;  %v1664_v38 = vpop.f32.mrf.mxu0 }
  0xf4   :  { %1150 = vmatprep.subr.mxu0 %v1380_v0  ;;  %v154_v56 = vadd.f32 %v1623_v28, %v1664_v38 }
  0xf5   :  { %1151 = vmatpush3.msra.mxu0 %v1406_v2  ;;  %v1666_v39 = vpop.f32.mrf.mxu0 }
  0xf6   :  { %1152 = vmatprep.subr.mxu0 %v1380_v0  ;;  %v169_v24 = vadd.f32 %v1666_v39, %v1623_v28 }
  0xf7   :  { %1153 = vmatpush3.msra.mxu0 %v1415_v3  ;;  %v1668_v40 = vpop.f32.mrf.mxu0 }
  0xf8   :  { %1154 = vmatprep.subr.mxu0 %v1380_v0 }
  0xf9   :  { %1155 = vmatpush3.msra.mxu0 %v1425_v5 }
  0xfa   :  { %1156 = vmatprep.subr.mxu0 %v1380_v0 }
  0xfb   :  { %1157 = vmatpush3.msra.mxu0 %v1438_v8 }
  0xfc   :  { %1158 = vmatprep.subr.mxu0 %v1380_v0 }
  0xfd   :  { %1159 = vmatpush3.msra.mxu0 %v1448_v10 }
  0xfe   :  { %1160 = vmatprep.subr.mxu0 %v1380_v0 }
  0xff   :  { %1161 = vmatpush3.msra.mxu0 %v1457_v11 }
 0x100   :  { %1162 = vmatprep.subr.mxu0 %v1380_v0 }
 0x101   :  { %1163 = vmatpush3.msra.mxu0 %v1466_v12 }
 0x102   :  { %1164 = vmatprep.subr.mxu0 %v1380_v0 }
 0x103   :  { %1165 = vmatpush3.msra.mxu0 %v1475_v13 }
 0x104   :  { %1166 = vmatprep.subr.mxu0 %v1380_v0 }
 0x105   :  { %1167 = vmatpush3.msra.mxu0 %v1484_v14 }
 0x106   :  { %1168 = vmatprep.subr.mxu0 %v1380_v0 }
 0x107   :  { %1169 = vmatpush3.msra.mxu0 %v1493_v15 }
 0x108   :  { %1170 = vmatprep.subr.mxu0 %v1380_v0 }
 0x109   :  { %1171 = vmatpush3.msra.mxu0 %v1502_v16 }
 0x10a   :  { %1172 = vmatprep.subr.mxu0 %v1380_v0 }
 0x10b   :  { %1173 = vmatpush3.msra.mxu0 %v1511_v17 }
 0x10c   :  { %1174 = vmatprep.subr.mxu0 %v1380_v0 }
 0x10d   :  { %1175 = vmatpush3.msra.mxu0 %v1520_v18 }
 0x10e   :  { %1176 = vmatprep.subr.mxu0 %v1380_v0 }
 0x10f   :  { %1177 = vmatpush3.msra.mxu0 %v1529_v19 }
 0x110   :  { %1178 = vmatprep.subr.mxu0 %v1380_v0 }
 0x111   :  { %1179 = vmatpush3.msra.mxu0 %v1538_v20 }
 0x112   :  { %1218 = vmatprep.subr.mxu0 %v1380_v0 }
 0x1b2   :  { %v310_v42 = vpop.f32.mrf.mxu0 }
 0x1b3   :  { %v314_v43 = vadd.f32 %v310_v42, %v139_v41 }
 0x1b4   :  { %v1112_v44 = vpop.f32.mrf.mxu0 }
 0x1b5   :  { %1362 = vtanh.f32 %v314_v43 }
 0x1c2   :  { %v1363_v45 = vpop.eup %1362 }
 0x1c3   :  { %1146 = vmatmul.mubr.f32.vlgmr.msra.gmra.mxu1 %v1363_v45 }
 0x1c4   :  { %1184 = vmatpush3.msra.mxu1 %v1401_v1  ;;  %1215 = vmatprep.mubr.msk.f32.mxu1 %vm1381_vm0, %v1380_v0 }
 0x1c5   :  { %1185 = vmatprep.subr.mxu1 %v1380_v0 }
 0x1c6   :  { %1186 = vmatpush3.msra.mxu1 %v1406_v2 }
 0x1c7   :  { %1187 = vmatprep.subr.mxu1 %v1380_v0 }
 0x1c8   :  { %1188 = vmatpush3.msra.mxu1 %v1415_v3 }
 0x1c9   :  { %1189 = vmatprep.subr.mxu1 %v1380_v0 }
 0x1ca   :  { %1190 = vmatpush3.msra.mxu1 %v1425_v5 }
 0x1cb   :  { %1191 = vmatprep.subr.mxu1 %v1380_v0 }
 0x1cc   :  { %1192 = vmatpush3.msra.mxu1 %v1438_v8 }
 0x1cd   :  { %1193 = vmatprep.subr.mxu1 %v1380_v0 }
 0x1ce   :  { %1194 = vmatpush3.msra.mxu1 %v1448_v10 }
 0x1cf   :  { %1195 = vmatprep.subr.mxu1 %v1380_v0 }
 0x1d0   :  { %1196 = vmatpush3.msra.mxu1 %v1457_v11 }
 0x1d1   :  { %1197 = vmatprep.subr.mxu1 %v1380_v0 }
 0x1d2   :  { %1198 = vmatpush3.msra.mxu1 %v1466_v12 }
 0x1d3   :  { %1199 = vmatprep.subr.mxu1 %v1380_v0 }
 0x1d4   :  { %1200 = vmatpush3.msra.mxu1 %v1475_v13 }
 0x1d5   :  { %1201 = vmatprep.subr.mxu1 %v1380_v0 }
 0x1d6   :  { %1202 = vmatpush3.msra.mxu1 %v1484_v14 }
 0x1d7   :  { %1203 = vmatprep.subr.mxu1 %v1380_v0 }
 0x1d8   :  { %1204 = vmatpush3.msra.mxu1 %v1493_v15 }
 0x1d9   :  { %1205 = vmatprep.subr.mxu1 %v1380_v0 }
 0x1da   :  { %1206 = vmatpush3.msra.mxu1 %v1502_v16 }
 0x1db   :  { %1207 = vmatprep.subr.mxu1 %v1380_v0 }
 0x1dc   :  { %1208 = vmatpush3.msra.mxu1 %v1511_v17 }
 0x1dd   :  { %1209 = vmatprep.subr.mxu1 %v1380_v0 }
 0x1de   :  { %1210 = vmatpush3.msra.mxu1 %v1520_v18 }
 0x1df   :  { %1211 = vmatprep.subr.mxu1 %v1380_v0 }
 0x1e0   :  { %1212 = vmatpush3.msra.mxu1 %v1529_v19 }
 0x1e1   :  { %1213 = vmatprep.subr.mxu1 %v1380_v0 }
 0x1e2   :  { %1214 = vmatpush3.msra.mxu1 %v1538_v20 }
 0x1e3   :  { %1253 = vmatprep.subr.mxu1 %v1380_v0 }
 0x283   :  { %v382_v47 = vpop.f32.mrf.mxu1 }
 0x284   :  { %v386_v48 = vadd.f32 %v382_v47, %v144_v46 }
 0x285   :  { %v1147_v49 = vpop.f32.mrf.mxu1 }
 0x286   :  { %1364 = vtanh.f32 %v386_v48 }
 0x293   :  { %v1365_v50 = vpop.eup %1364 }
 0x294   :  { %1181 = vmatmul.mubr.f32.vlgmr.msra.gmra.mxu0 %v1365_v50 }
 0x295   :  { %1219 = vmatpush3.msra.mxu0 %v1401_v1  ;;  %1250 = vmatprep.mubr.msk.f32.mxu0 %vm1381_vm0, %v1380_v0 }
 0x296   :  { %1220 = vmatprep.subr.mxu0 %v1380_v0 }
 0x297   :  { %1221 = vmatpush3.msra.mxu0 %v1406_v2 }
 0x298   :  { %1222 = vmatprep.subr.mxu0 %v1380_v0 }
 0x299   :  { %1223 = vmatpush3.msra.mxu0 %v1415_v3 }
 0x29a   :  { %1224 = vmatprep.subr.mxu0 %v1380_v0 }
 0x29b   :  { %1225 = vmatpush3.msra.mxu0 %v1425_v5 }
 0x29c   :  { %1226 = vmatprep.subr.mxu0 %v1380_v0 }
 0x29d   :  { %1227 = vmatpush3.msra.mxu0 %v1438_v8 }
 0x29e   :  { %1228 = vmatprep.subr.mxu0 %v1380_v0 }
 0x29f   :  { %1229 = vmatpush3.msra.mxu0 %v1448_v10 }
 0x2a0   :  { %1230 = vmatprep.subr.mxu0 %v1380_v0 }
 0x2a1   :  { %1231 = vmatpush3.msra.mxu0 %v1457_v11 }
 0x2a2   :  { %1232 = vmatprep.subr.mxu0 %v1380_v0 }
 0x2a3   :  { %1233 = vmatpush3.msra.mxu0 %v1466_v12 }
 0x2a4   :  { %1234 = vmatprep.subr.mxu0 %v1380_v0 }
 0x2a5   :  { %1235 = vmatpush3.msra.mxu0 %v1475_v13 }
 0x2a6   :  { %1236 = vmatprep.subr.mxu0 %v1380_v0 }
 0x2a7   :  { %1237 = vmatpush3.msra.mxu0 %v1484_v14 }
 0x2a8   :  { %1238 = vmatprep.subr.mxu0 %v1380_v0 }
 0x2a9   :  { %1239 = vmatpush3.msra.mxu0 %v1493_v15 }
 0x2aa   :  { %1240 = vmatprep.subr.mxu0 %v1380_v0 }
 0x2ab   :  { %1241 = vmatpush3.msra.mxu0 %v1502_v16 }
 0x2ac   :  { %1242 = vmatprep.subr.mxu0 %v1380_v0 }
 0x2ad   :  { %1243 = vmatpush3.msra.mxu0 %v1511_v17 }
 0x2ae   :  { %1244 = vmatprep.subr.mxu0 %v1380_v0 }
 0x2af   :  { %1245 = vmatpush3.msra.mxu0 %v1520_v18 }
 0x2b0   :  { %1246 = vmatprep.subr.mxu0 %v1380_v0 }
 0x2b1   :  { %1247 = vmatpush3.msra.mxu0 %v1529_v19 }
 0x2b2   :  { %1248 = vmatprep.subr.mxu0 %v1380_v0 }
 0x2b3   :  { %1249 = vmatpush3.msra.mxu0 %v1538_v20 }
 0x2b4   :  { %1288 = vmatprep.subr.mxu0 %v1380_v0 }
 0x354   :  { %v454_v52 = vpop.f32.mrf.mxu0 }
 0x355   :  { %v458_v53 = vadd.f32 %v454_v52, %v149_v51 }
 0x356   :  { %v1182_v54 = vpop.f32.mrf.mxu0 }
 0x357   :  { %1366 = vtanh.f32 %v458_v53 }
 0x364   :  { %v1367_v55 = vpop.eup %1366 }
 0x365   :  { %1216 = vmatmul.mubr.f32.vlgmr.msra.gmra.mxu1 %v1367_v55 }
 0x366   :  { %1254 = vmatpush3.msra.mxu1 %v1401_v1  ;;  %1285 = vmatprep.mubr.msk.f32.mxu1 %vm1381_vm0, %v1380_v0 }
 0x367   :  { %1255 = vmatprep.subr.mxu1 %v1380_v0 }
 0x368   :  { %1256 = vmatpush3.msra.mxu1 %v1406_v2 }
 0x369   :  { %1257 = vmatprep.subr.mxu1 %v1380_v0 }
 0x36a   :  { %1258 = vmatpush3.msra.mxu1 %v1415_v3 }
 0x36b   :  { %1259 = vmatprep.subr.mxu1 %v1380_v0 }
 0x36c   :  { %1260 = vmatpush3.msra.mxu1 %v1425_v5 }
 0x36d   :  { %1261 = vmatprep.subr.mxu1 %v1380_v0 }
 0x36e   :  { %1262 = vmatpush3.msra.mxu1 %v1438_v8 }
 0x36f   :  { %1263 = vmatprep.subr.mxu1 %v1380_v0 }
 0x370   :  { %1264 = vmatpush3.msra.mxu1 %v1448_v10 }
 0x371   :  { %1265 = vmatprep.subr.mxu1 %v1380_v0 }
 0x372   :  { %1266 = vmatpush3.msra.mxu1 %v1457_v11 }
 0x373   :  { %1267 = vmatprep.subr.mxu1 %v1380_v0 }
 0x374   :  { %1268 = vmatpush3.msra.mxu1 %v1466_v12 }
 0x375   :  { %1269 = vmatprep.subr.mxu1 %v1380_v0 }
 0x376   :  { %1270 = vmatpush3.msra.mxu1 %v1475_v13 }
 0x377   :  { %1271 = vmatprep.subr.mxu1 %v1380_v0 }
 0x378   :  { %1272 = vmatpush3.msra.mxu1 %v1484_v14 }
 0x379   :  { %1273 = vmatprep.subr.mxu1 %v1380_v0 }
 0x37a   :  { %1274 = vmatpush3.msra.mxu1 %v1493_v15 }
 0x37b   :  { %1275 = vmatprep.subr.mxu1 %v1380_v0 }
 0x37c   :  { %1276 = vmatpush3.msra.mxu1 %v1502_v16 }
 0x37d   :  { %1277 = vmatprep.subr.mxu1 %v1380_v0 }
 0x37e   :  { %1278 = vmatpush3.msra.mxu1 %v1511_v17 }
 0x37f   :  { %1279 = vmatprep.subr.mxu1 %v1380_v0 }
 0x380   :  { %1280 = vmatpush3.msra.mxu1 %v1520_v18 }
 0x381   :  { %1281 = vmatprep.subr.mxu1 %v1380_v0 }
 0x382   :  { %1282 = vmatpush3.msra.mxu1 %v1529_v19 }
 0x383   :  { %1283 = vmatprep.subr.mxu1 %v1380_v0 }
 0x384   :  { %1284 = vmatpush3.msra.mxu1 %v1538_v20 }
 0x385   :  { %1323 = vmatprep.subr.mxu1 %v1380_v0 }
 0x425   :  { %v526_v57 = vpop.f32.mrf.mxu1 }
 0x426   :  { %v530_v58 = vadd.f32 %v526_v57, %v154_v56 }
 0x427   :  { %v1217_v59 = vpop.f32.mrf.mxu1 }
 0x428   :  { %1368 = vtanh.f32 %v530_v58 }
 0x435   :  { %v1369_v60 = vpop.eup %1368 }
 0x436   :  { %1251 = vmatmul.mubr.f32.vlgmr.msra.gmra.mxu0 %v1369_v60 }
 0x437   :  { %1289 = vmatpush3.msra.mxu0 %v1401_v1  ;;  %1320 = vmatprep.mubr.msk.f32.mxu0 %vm1381_vm0, %v1380_v0 }
 0x438   :  { %1290 = vmatprep.subr.mxu0 %v1380_v0 }
 0x439   :  { %1291 = vmatpush3.msra.mxu0 %v1406_v2 }
 0x43a   :  { %1292 = vmatprep.subr.mxu0 %v1380_v0 }
 0x43b   :  { %1293 = vmatpush3.msra.mxu0 %v1415_v3  ;;  %v763_v3 = vld [vmem:[%s1888_s1 + $0x110] sm:$0xff] }
 0x43c   :  { %1294 = vmatprep.subr.mxu0 %v1380_v0 }
 0x43d   :  { %1295 = vmatpush3.msra.mxu0 %v1425_v5  ;;  %v761_v5 = vld [vmem:[%s1888_s1 + $0x100] sm:$0xff] }
 0x43e   :  { %1296 = vmatprep.subr.mxu0 %v1380_v0 }
 0x43f   :  { %1297 = vmatpush3.msra.mxu0 %v1438_v8  ;;  %v758_v8 = vld [vmem:[%s1888_s1 + $0xe8] sm:$0xff] }
 0x440   :  { %1298 = vmatprep.subr.mxu0 %v1380_v0 }
 0x441   :  { %1299 = vmatpush3.msra.mxu0 %v1448_v10  ;;  %v164_v10 = vadd.f32 %v1623_v28, %v1668_v40 }
 0x442   :  { %1300 = vmatprep.subr.mxu0 %v1380_v0 }
 0x443   :  { %1301 = vmatpush3.msra.mxu0 %v1457_v11 }
 0x444   :  { %1302 = vmatprep.subr.mxu0 %v1380_v0 }
 0x445   :  { %1303 = vmatpush3.msra.mxu0 %v1466_v12 }
 0x446   :  { %1304 = vmatprep.subr.mxu0 %v1380_v0 }
 0x447   :  { %1305 = vmatpush3.msra.mxu0 %v1475_v13 }
 0x448   :  { %1306 = vmatprep.subr.mxu0 %v1380_v0 }
 0x449   :  { %1307 = vmatpush3.msra.mxu0 %v1484_v14 }
 0x44a   :  { %1308 = vmatprep.subr.mxu0 %v1380_v0 }
 0x44b   :  { %1309 = vmatpush3.msra.mxu0 %v1493_v15  ;;  %v756_v15 = vld [vmem:[%s1888_s1 + $0xd8] sm:$0xff] }
 0x44c   :  { %1310 = vmatprep.subr.mxu0 %v1380_v0 }
 0x44d   :  { %1311 = vmatpush3.msra.mxu0 %v1502_v16  ;;  %v755_v16 = vld [vmem:[%s1888_s1 + $0xd0] sm:$0xff] }
 0x44e   :  { %1312 = vmatprep.subr.mxu0 %v1380_v0 }
 0x44f   :  { %1313 = vmatpush3.msra.mxu0 %v1511_v17  ;;  %v754_v17 = vld [vmem:[%s1888_s1 + $0xc8] sm:$0xff] }
 0x450   :  { %1314 = vmatprep.subr.mxu0 %v1380_v0 }
 0x451   :  { %1315 = vmatpush3.msra.mxu0 %v1520_v18  ;;  %v753_v18 = vld [vmem:[%s1888_s1 + $0xc0] sm:$0xff] }
 0x452   :  { %1316 = vmatprep.subr.mxu0 %v1380_v0 }
 0x453   :  { %1317 = vmatpush3.msra.mxu0 %v1529_v19  ;;  %v752_v19 = vld [vmem:[%s1888_s1 + $0xb8] sm:$0xff] }
 0x454   :  { %1318 = vmatprep.subr.mxu0 %v1380_v0 }
 0x455   :  { %1319 = vmatpush3.msra.mxu0 %v1538_v20  ;;  %v751_v20 = vld [vmem:[%s1888_s1 + $0xb0] sm:$0xff] }
 0x4f6   :  { %v598_v62 = vpop.f32.mrf.mxu0 }
 0x4f7   :  { %v602_v63 = vadd.f32 %v598_v62, %v159_v61 }
 0x4f8   :  { %v1252_v1 = vpop.f32.mrf.mxu0 }
 0x4f9   :  { %1370 = vtanh.f32 %v602_v63 }
 0x506   :  { %v1371_v2 = vpop.eup %1370 }
 0x507   :  { %1286 = vmatmul.mubr.f32.vlgmr.msra.gmra.mxu1 %v1371_v2 }
 0x508   :  { %1355 = vmatprep.mubr.msk.f32.mxu1 %vm1381_vm0, %v1380_v0  ;;  %1324 = vmatpush3.msra.mxu1 %v763_v3 }
 0x509   :  { %1325 = vmatprep.subr.mxu1 %v1380_v0 }
 0x50a   :  { %1326 = vmatpush3.msra.mxu1 %v762_v4 }
 0x50b   :  { %1327 = vmatprep.subr.mxu1 %v1380_v0 }
 0x50c   :  { %1328 = vmatpush3.msra.mxu1 %v761_v5 }
 0x50d   :  { %1329 = vmatprep.subr.mxu1 %v1380_v0 }
 0x50e   :  { %1330 = vmatpush3.msra.mxu1 %v760_v6 }
 0x50f   :  { %1331 = vmatprep.subr.mxu1 %v1380_v0 }
 0x510   :  { %1332 = vmatpush3.msra.mxu1 %v759_v7 }
 0x511   :  { %1333 = vmatprep.subr.mxu1 %v1380_v0 }
 0x512   :  { %1334 = vmatpush3.msra.mxu1 %v758_v8 }
 0x513   :  { %1335 = vmatprep.subr.mxu1 %v1380_v0 }
 0x514   :  { %1336 = vmatpush3.msra.mxu1 %v757_v9 }
 0x515   :  { %1337 = vmatprep.subr.mxu1 %v1380_v0 }
 0x516   :  { %1338 = vmatpush3.msra.mxu1 %v756_v15 }
 0x517   :  { %1339 = vmatprep.subr.mxu1 %v1380_v0 }
 0x518   :  { %1340 = vmatpush3.msra.mxu1 %v755_v16 }
 0x519   :  { %1341 = vmatprep.subr.mxu1 %v1380_v0 }
 0x51a   :  { %1342 = vmatpush3.msra.mxu1 %v754_v17 }
 0x51b   :  { %1343 = vmatprep.subr.mxu1 %v1380_v0 }
 0x51c   :  { %1344 = vmatpush3.msra.mxu1 %v753_v18 }
 0x51d   :  { %1345 = vmatprep.subr.mxu1 %v1380_v0 }
 0x51e   :  { %1346 = vmatpush3.msra.mxu1 %v752_v19 }
 0x51f   :  { %1347 = vmatprep.subr.mxu1 %v1380_v0 }
 0x520   :  { %1348 = vmatpush3.msra.mxu1 %v751_v20 }
 0x521   :  { %1349 = vmatprep.subr.mxu1 %v1380_v0 }
 0x522   :  { %1350 = vmatpush3.msra.mxu1 %v750_v21 }
 0x523   :  { %1351 = vmatprep.subr.mxu1 %v1380_v0 }
 0x524   :  { %1352 = vmatpush3.msra.mxu1 %v749_v22 }
 0x525   :  { %1353 = vmatprep.subr.mxu1 %v1380_v0 }
 0x526   :  { %1354 = vmatpush3.msra.mxu1 %v748_v23 }
 0x5c7   :  { %v670_v11 = vpop.f32.mrf.mxu1 }
 0x5c8   :  { %v674_v12 = vadd.f32 %v670_v11, %v164_v10 }
 0x5c9   :  { %v1287_v13 = vpop.f32.mrf.mxu1 }
 0x5ca   :  { %1372 = vtanh.f32 %v674_v12 }
 0x5d7   :  { %v1373_v14 = vpop.eup %1372 }
 0x5d8   :  { %1321 = vmatmul.mubr.f32.vlgmr.msra.gmra.mxu0 %v1373_v14 }
 0x698   :  { %v742_v25 = vpop.f32.mrf.mxu0 }
 0x699   :  { %v746_v26 = vadd.f32 %v742_v25, %v169_v24 }
 0x69a   :  { %v1322_v27 = vpop.f32.mrf.mxu0 }
 0x69b   :  { %1374 = vtanh.f32 %v746_v26 }
 0x6a8   :  { %v1375_v29 = vpop.eup %1374 }
 0x6a9   :  { %1356 = vmatmul.mubr.f32.vlgmr.msra.gmra.mxu1 %v1375_v29 }
 0x769   :  { %v835_v31 = vpop.f32.mrf.mxu1 }
 0x76a   :  { %v836_v32 = vadd.f32 %v863_v30, %v835_v31 }
 0x76b   :  { %v1357_v33 = vpop.f32.mrf.mxu1 }
 0x76c   :  { %839 = vmax.xlane.f32.xlu0 %v836_v32 }
 0x7f5   :  { %v840_v34 = vpop.xlane.xlu0 %839 }
 0x7f6   :  { %v841_v0 = vsub.f32 %v836_v32, %v840_v34 }
 0x7f8   :  { %v842_v35 = vmul.f32 1.442695, %v841_v0 }
 0x7fa   :  { %1376 = vpow2.f32 %v842_v35 }
 0x807   :  { %v1377_v36 = vpop.eup %1376 }
 0x808   :  { %844 = vadd.xlane.f32.xlu0 %v1377_v36 }
 0x891   :  { %v845_v28 = vpop.xlane.xlu0 %844 }
 0x892   :  { %1378 = vlog2.f32 %v845_v28 }
 0x89f   :  { %v1379_v37 = vpop.eup %1378 }
 0x8a0   :  { %v847_v38 = vmul.f32 0.6931472, %v1379_v37 }
 0x8a2   :  { %v848_v39 = vsub.f32 %v841_v0, %v847_v38 }
 0x8a4   :  { %849 = vst [vmem:[%s1890_s2] sm:$0xff] %v848_v39 }

</bundles_post_ra>
